<compile_context>
chip_gen: v5e
topology: v5e:2x2
jax: 0.10.0
libtpu: 0.0.40
codegen_flags: <defaults>
</compile_context>

<pallas_src>
import jax
import jax.numpy as jnp
from jax import lax
from jax.experimental import pallas as pl
from jax.experimental.pallas import tpu as pltpu


# ----------------------------------------------------------------------------
# helpers
# ----------------------------------------------------------------------------
def _round_up(x, m):
    return (x + m - 1) // m * m


def _pad_axis(x, axis, target):
    pad = target - x.shape[axis]
    if pad == 0:
        return x
    widths = [(0, 0)] * x.ndim
    widths[axis] = (0, pad)
    return jnp.pad(x, widths)


def _pick_tile(n, candidates):
    for c in candidates:
        if n % c == 0:
            return c
    return n


# ----------------------------------------------------------------------------
# Kernel 1: fused patch-projection + fc
#   out = ((x @ Wp + bp) @ Wf + bf)
#   x: bf16 (Mp, Kp), Wp: bf16 (Kp, Lp), Wf: bf16 (Lp, Dp), biases f32.
#   Grid (M/tm, K/tk); f32 accumulator in VMEM; second matmul and both bias
#   adds happen only on the last K step, so the (tm, Lp) hidden activation
#   never leaves VMEM.
# ----------------------------------------------------------------------------
def _fused_proj_fc_kernel(x_ref, wp_ref, bp_ref, wf_ref, bf_ref, o_ref, acc_ref):
    k = pl.program_id(1)

    @pl.when(k == 0)
    def _():
        acc_ref[...] = jnp.zeros_like(acc_ref)

    acc_ref[...] += jnp.dot(x_ref[...], wp_ref[...],
                            preferred_element_type=jnp.float32)

    @pl.when(k == pl.num_programs(1) - 1)
    def _():
        hidden = (acc_ref[...] + bp_ref[...]).astype(jnp.bfloat16)
        out = jnp.dot(hidden, wf_ref[...],
                      preferred_element_type=jnp.float32) + bf_ref[...]
        o_ref[...] = out.astype(o_ref.dtype)


def fused_proj_fc(x2d, wp, bp, wf, bf):
    """x2d: (Mp, Kp) bf16; wp: (Kp, Lp) bf16; bp: (1, Lp) f32;
       wf: (Lp, Dp) bf16; bf: (1, Dp) f32  ->  (Mp, Dp) f32."""
    M, K = x2d.shape
    Kw, Lp = wp.shape
    Lw, Dp = wf.shape
    assert K == Kw and Lp == Lw

    tm = _pick_tile(M, (256, 128, 64, 32, 16, 8))
    tk = _pick_tile(K, (512, 256, 128))
    grid = (M // tm, K // tk)

    return pl.pallas_call(
        _fused_proj_fc_kernel,
        out_shape=jax.ShapeDtypeStruct((M, Dp), jnp.float32),
        grid=grid,
        in_specs=[
            pl.BlockSpec((tm, tk), lambda i, k: (i, k)),
            pl.BlockSpec((tk, Lp), lambda i, k: (k, 0)),
            pl.BlockSpec((1, Lp), lambda i, k: (0, 0)),
            pl.BlockSpec((Lp, Dp), lambda i, k: (0, 0)),
            pl.BlockSpec((1, Dp), lambda i, k: (0, 0)),
        ],
        out_specs=pl.BlockSpec((tm, Dp), lambda i, k: (i, 0)),
        scratch_shapes=[pltpu.VMEM((tm, Lp), jnp.float32)],
        compiler_params=pltpu.CompilerParams(
            dimension_semantics=("parallel", "arbitrary")),
    )(x2d, wp, bp, wf, bf)


# ----------------------------------------------------------------------------
# Kernel 2: learned attention block + sparsity loss (computed exactly once).
#   learn_att = diag + (1 - diag) * sigmoid(W)        (L, L)
#   loss      = mean(|(1 - diag) * sigmoid(W)|)       scalar -> SMEM
# ----------------------------------------------------------------------------
def _learn_att_kernel(lw_ref, att_ref, loss_ref):
    L = lw_ref.shape[0]
    learn = jax.nn.sigmoid(lw_ref[...])
    row = lax.broadcasted_iota(jnp.int32, (L, L), 0)
    col = lax.broadcasted_iota(jnp.int32, (L, L), 1)
    diag = (row == col).astype(jnp.float32)
    video_att = (1.0 - diag) * learn
    att_ref[...] = diag + video_att
    # mean(|video_att|); diag entries are zero but counted in the denominator,
    # matching the PyTorch reference.
    loss_ref[0, 0] = jnp.sum(jnp.abs(video_att)) * (1.0 / (L * L))


def learn_att_pallas(learn_w_LL):
    L = learn_w_LL.shape[0]
    return pl.pallas_call(
        _learn_att_kernel,
        out_shape=(
            jax.ShapeDtypeStruct((L, L), jnp.float32),
            jax.ShapeDtypeStruct((1, 1), jnp.float32),
        ),
        grid=(1,),
        in_specs=[pl.BlockSpec((L, L), lambda i: (0, 0))],
        out_specs=(
            pl.BlockSpec((L, L), lambda i: (0, 0)),
            pl.BlockSpec(memory_space=pltpu.MemorySpace.SMEM),
        ),
        compiler_params=pltpu.CompilerParams(
            dimension_semantics=("arbitrary",)),
    )(learn_w_LL)


# ----------------------------------------------------------------------------
# Kernel 3: in-place attention-mask update, tiled over batch.
#   attention_mask[:, -L:, -L:] = learn_att
# ----------------------------------------------------------------------------
def _mask_update_kernel(att_ref, la_ref, out_ref):
    T = att_ref.shape[1]
    L = la_ref.shape[0]
    out_ref[...] = att_ref[...]
    out_ref[:, pl.ds(T - L, L), pl.ds(T - L, L)] = la_ref[...][None, :, :]


def mask_update_pallas(attention_mask_f32, learn_att):
    B, T, _ = attention_mask_f32.shape
    L = learn_att.shape[0]
    return pl.pallas_call(
        _mask_update_kernel,
        out_shape=jax.ShapeDtypeStruct((B, T, T), jnp.float32),
        grid=(B,),
        in_specs=[
            pl.BlockSpec((1, T, T), lambda b: (b, 0, 0)),
            pl.BlockSpec((L, L), lambda b: (0, 0)),
        ],
        out_specs=pl.BlockSpec((1, T, T), lambda b: (b, 0, 0)),
        input_output_aliases={0: 0},   # in-place overwrite of the f32 mask
        compiler_params=pltpu.CompilerParams(
            dimension_semantics=("parallel",)),
    )(attention_mask_f32, learn_att)


# ----------------------------------------------------------------------------
# Stand-in transformer encoder.
# TODO(synk): trans_encoder is an external submodule; stubbed with a
# deterministic mean-pool over video tokens so the output tuple has a value.
# ----------------------------------------------------------------------------
def trans_encoder_stub(vid_feats, attention_mask):
    pooled = jnp.mean(vid_feats, axis=1)
    return (pooled, attention_mask)


# ----------------------------------------------------------------------------
# VideoTransformer (forward only), parameters initialized deterministically.
# ----------------------------------------------------------------------------
class VideoTransformerPallas:
    def __init__(self, key, *, in_channels, patch, latent_feat_size,
                 img_feature_dim, max_img_seq_length,
                 use_grid_feat=True, learn_mask_enabled=True,
                 sparse_mask_soft2hard=False):
        self.patch = patch
        self.latent_feat_size = latent_feat_size
        self.img_feature_dim = img_feature_dim
        self.max_img_seq_length = max_img_seq_length
        self.use_grid_feat = use_grid_feat
        self.learn_mask_enabled = learn_mask_enabled
        self.sparse_mask_soft2hard = sparse_mask_soft2hard

        pt, ph, pw = patch
        pdim = in_channels * pt * ph * pw
        # lane-dense padded dims (multiples of 128)
        self.Kp = _round_up(pdim, 128)
        self.Lp = _round_up(latent_feat_size, 128)
        self.Dp = _round_up(img_feature_dim, 128)

        k0, k1, k2, k3 = jax.random.split(key, 4)
        # TODO(synk): the real Video Swin backbone is an external submodule;
        # its patch-embedding is stood in by this deterministic projection.
        patch_proj_w = (jax.random.normal(k0, (pdim, latent_feat_size), jnp.float32)
                        * (1.0 / jnp.sqrt(pdim)))
        patch_proj_b = jnp.zeros((1, latent_feat_size), jnp.float32)
        # self.fc = nn.Linear(latent_feat_size, img_feature_dim)
        fc_w = (jax.random.normal(k1, (latent_feat_size, img_feature_dim), jnp.float32)
                * (1.0 / jnp.sqrt(latent_feat_size)))
        fc_b = jax.random.normal(k2, (1, img_feature_dim), jnp.float32) * 0.01

        # padded, MXU-ready parameter copies (bf16 operands, f32 biases)
        self.wp = _pad_axis(_pad_axis(patch_proj_w, 0, self.Kp), 1, self.Lp
                            ).astype(jnp.bfloat16)
        self.bp = _pad_axis(patch_proj_b, 1, self.Lp)
        self.wf = _pad_axis(_pad_axis(fc_w, 0, self.Lp), 1, self.Dp
                            ).astype(jnp.bfloat16)
        self.bf = _pad_axis(fc_b, 1, self.Dp)

        # self.learn_vid_att = nn.Embedding(L*L, 1) -> weight (L*L, 1)
        L = max_img_seq_length
        self.learn_vid_att_w = jax.random.normal(k3, (L * L, 1), jnp.float32)

    def forward(self, img_feats, attention_mask):
        B, S, C, H, W = img_feats.shape
        pt, ph, pw = self.patch
        Tn, Hn, Wn = S // pt, H // ph, W // pw
        n_tok = Tn * Hn * Wn
        M = B * n_tok
        K = C * pt * ph * pw

        # Patch extraction, channels-last end to end.  This single transpose is
        # the fused equivalent of images.permute(0,2,1,3,4) -> swin patch embed
        # -> vid_feats.permute(0,2,3,4,1); it packs (C,pt,ph,pw) as the
        # contiguous last axis so the Pallas input DMA is lane-dense.
        x = img_feats.reshape(B, Tn, pt, C, Hn, ph, Wn, pw)
        x = jnp.transpose(x, (0, 1, 4, 6, 3, 2, 5, 7)).reshape(M, K)

        # pad K to the padded weight size, M up to a sublane multiple; bf16 in.
        x = _pad_axis(x, 1, self.Kp)
        x = _pad_axis(x, 0, _round_up(M, 8)).astype(jnp.bfloat16)

        # --- fused (patch-proj @ fc) hot path, single Pallas kernel ---
        out = fused_proj_fc(x, self.wp, self.bp, self.wf, self.bf)  # (Mp, Dp) f32
        vid_feats = out[:M, :self.img_feature_dim].reshape(
            B, n_tok, self.img_feature_dim)

        loss_sparsity = None
        if self.learn_mask_enabled:
            L = self.max_img_seq_length
            learn_att, loss = learn_att_pallas(self.learn_vid_att_w.reshape(L, L))
            if self.sparse_mask_soft2hard:
                # TODO(synk): soft2hard thresholding path not exercised in this
                # synthetic run.
                pass
            att_f32 = attention_mask.astype(jnp.float32)   # cast exactly once
            attention_mask = mask_update_pallas(att_f32, learn_att)
            loss_sparsity = loss[0, 0]

        outputs = trans_encoder_stub(vid_feats, attention_mask)
        if self.learn_mask_enabled:
            outputs = outputs + (loss_sparsity,)
        return outputs


if __name__ == "__main__":
    key = jax.random.PRNGKey(0)
    k_param, k_img, k_mask = jax.random.split(key, 3)

    # Small shapes: B=2 clips, S=4 frames, C=3 channels, 32x32 spatial.
    B, S, C, H, W = 2, 4, 3, 32, 32
    patch = (2, 16, 16)                      # -> T'=2, H'=2, W'=2 -> 8 video tokens
    latent_feat_size = 32
    img_feature_dim = 64
    max_img_seq_length = 8                   # == number of video tokens
    text_len = 8
    T_total = text_len + max_img_seq_length  # attention mask is (B, 16, 16)

    model = VideoTransformerPallas(
        k_param,
        in_channels=C,
        patch=patch,
        latent_feat_size=latent_feat_size,
        img_feature_dim=img_feature_dim,
        max_img_seq_length=max_img_seq_length,
        use_grid_feat=True,
        learn_mask_enabled=True,
    )

    img_feats = jax.random.normal(k_img, (B, S, C, H, W), jnp.float32)
    attention_mask = (jax.random.uniform(k_mask, (B, T_total, T_total)) > 0.2
                      ).astype(jnp.int32)

    outputs = model.forward(img_feats, attention_mask)
    outputs = jax.block_until_ready(outputs)

    pooled, new_mask, loss_sparsity = outputs
    assert pooled.shape == (B, img_feature_dim)
    assert new_mask.shape == (B, T_total, T_total)
    assert new_mask.dtype == jnp.float32
    assert loss_sparsity.shape == ()
    print("KERNEL_OK")
</pallas_src>

<mosaic_0001>
module attributes {stable_mosaic.version = 11 : i64} {
  func.func @_fused_proj_fc_kernel(%arg0: i32, %arg1: i32, %arg2: memref<16x512xbf16, #tpu.memory_space<vmem>>, %arg3: memref<512x128xbf16, #tpu.memory_space<vmem>>, %arg4: memref<1x128xf32, #tpu.memory_space<vmem>>, %arg5: memref<128x128xbf16, #tpu.memory_space<vmem>>, %arg6: memref<1x128xf32, #tpu.memory_space<vmem>>, %arg7: memref<16x128xf32, #tpu.memory_space<vmem>>, %arg8: memref<16x128xf32, #tpu.memory_space<vmem>>) attributes {dimension_semantics = [#tpu.dimension_semantics<parallel>, #tpu.dimension_semantics<arbitrary>], iteration_bounds = array<i64: 1, 3>, scalar_prefetch = 0 : i64, scratch_operands = 1 : i64, tpu.core_type = #tpu.core_type<tc>, window_params = [{transform_indices = @transform_0, window_bounds = array<i64: 16, 512>}, {transform_indices = @transform_1, window_bounds = array<i64: 512, 128>}, {pipeline_mode = #tpu.pipeline_mode<synchronous>, transform_indices = @transform_2, window_bounds = array<i64: 1, 128>}, {pipeline_mode = #tpu.pipeline_mode<synchronous>, transform_indices = @transform_3, window_bounds = array<i64: 128, 128>}, {pipeline_mode = #tpu.pipeline_mode<synchronous>, transform_indices = @transform_4, window_bounds = array<i64: 1, 128>}, {transform_indices = @transform_5, window_bounds = array<i64: 16, 128>}]} {
    %c0_i32 = arith.constant 0 : i32
    %0 = arith.cmpi eq, %arg1, %c0_i32 : i32
    %1 = arith.extui %0 : i1 to i32
    %c0_i32_0 = arith.constant 0 : i32
    %2 = arith.cmpi ne, %1, %c0_i32_0 : i32
    scf.if %2 {
      %cst_9 = arith.constant 0.000000e+00 : f32
      %12 = vector.broadcast %cst_9 : f32 to vector<16x128xf32>
      %c0_10 = arith.constant 0 : index
      %c0_11 = arith.constant 0 : index
      %13 = vector.load %arg8[%c0_10, %c0_11] : memref<16x128xf32, #tpu.memory_space<vmem>>, vector<16x128xf32>
      tpu.vector_store %arg8[%c0_10, %c0_11], %12 {strides = array<i32>} : memref<16x128xf32, #tpu.memory_space<vmem>>, vector<16x128xf32>,
    } else {
    }
    %c0 = arith.constant 0 : index
    %c0_1 = arith.constant 0 : index
    %3 = vector.load %arg8[%c0, %c0_1] : memref<16x128xf32, #tpu.memory_space<vmem>>, vector<16x128xf32>
    %c0_2 = arith.constant 0 : index
    %c0_3 = arith.constant 0 : index
    %4 = vector.load %arg2[%c0_2, %c0_3] : memref<16x512xbf16, #tpu.memory_space<vmem>>, vector<16x512xbf16>
    %c0_4 = arith.constant 0 : index
    %c0_5 = arith.constant 0 : index
    %5 = vector.load %arg3[%c0_4, %c0_5] : memref<512x128xbf16, #tpu.memory_space<vmem>>, vector<512x128xbf16>
    %cst = arith.constant dense<0.000000e+00> : vector<16x128xf32>
    %6 = tpu.matmul %4, %5, %cst {dimension_numbers = #tpu.dot_dimension_numbers<[1], [0], [0], [1], [0, 0, 1, 1], [], []>} : vector<16x512xbf16>, vector<512x128xbf16>, vector<16x128xf32> -> vector<16x128xf32>
    %7 = arith.addf %3, %6 : vector<16x128xf32>
    %c0_6 = arith.constant 0 : index
    %c0_7 = arith.constant 0 : index
    %8 = vector.load %arg8[%c0_6, %c0_7] : memref<16x128xf32, #tpu.memory_space<vmem>>, vector<16x128xf32>
    tpu.vector_store %arg8[%c0_6, %c0_7], %7 {strides = array<i32>} : memref<16x128xf32, #tpu.memory_space<vmem>>, vector<16x128xf32>,
    %c2_i32 = arith.constant 2 : i32
    %9 = arith.cmpi eq, %arg1, %c2_i32 : i32
    %10 = arith.extui %9 : i1 to i32
    %c0_i32_8 = arith.constant 0 : i32
    %11 = arith.cmpi ne, %10, %c0_i32_8 : i32
    scf.if %11 {
      %c0_9 = arith.constant 0 : index
      %c0_10 = arith.constant 0 : index
      %12 = vector.load %arg8[%c0_9, %c0_10] : memref<16x128xf32, #tpu.memory_space<vmem>>, vector<16x128xf32>
      %c0_11 = arith.constant 0 : index
      %c0_12 = arith.constant 0 : index
      %13 = vector.load %arg4[%c0_11, %c0_12] : memref<1x128xf32, #tpu.memory_space<vmem>>, vector<1x128xf32>
      %14 = vector.broadcast %13 : vector<1x128xf32> to vector<16x128xf32>
      %15 = arith.addf %12, %14 : vector<16x128xf32>
      %16 = arith.truncf %15 : vector<16x128xf32> to vector<16x128xbf16>
      %c0_13 = arith.constant 0 : index
      %c0_14 = arith.constant 0 : index
      %17 = vector.load %arg5[%c0_13, %c0_14] : memref<128x128xbf16, #tpu.memory_space<vmem>>, vector<128x128xbf16>
      %cst_15 = arith.constant dense<0.000000e+00> : vector<16x128xf32>
      %18 = tpu.matmul %16, %17, %cst_15 {dimension_numbers = #tpu.dot_dimension_numbers<[1], [0], [0], [1], [0, 0, 1, 1], [], []>} : vector<16x128xbf16>, vector<128x128xbf16>, vector<16x128xf32> -> vector<16x128xf32>
      %c0_16 = arith.constant 0 : index
      %c0_17 = arith.constant 0 : index
      %19 = vector.load %arg6[%c0_16, %c0_17] : memref<1x128xf32, #tpu.memory_space<vmem>>, vector<1x128xf32>
      %20 = vector.broadcast %19 : vector<1x128xf32> to vector<16x128xf32>
      %21 = arith.addf %18, %20 : vector<16x128xf32>
      %c0_18 = arith.constant 0 : index
      %c0_19 = arith.constant 0 : index
      %22 = vector.load %arg7[%c0_18, %c0_19] : memref<16x128xf32, #tpu.memory_space<vmem>>, vector<16x128xf32>
      tpu.vector_store %arg7[%c0_18, %c0_19], %21 {strides = array<i32>} : memref<16x128xf32, #tpu.memory_space<vmem>>, vector<16x128xf32>,
    } else {
    }
    return
  }
  func.func @transform_0(%arg0: i32, %arg1: i32) -> (i32, i32) {
    %c0_i32 = arith.constant 0 : i32
    return %arg0, %arg1 : i32, i32
  }
  func.func @transform_1(%arg0: i32, %arg1: i32) -> (i32, i32) {
    %c0_i32 = arith.constant 0 : i32
    %c0_i32_0 = arith.constant 0 : i32
    return %arg1, %c0_i32 : i32, i32
  }
  func.func @transform_2(%arg0: i32, %arg1: i32) -> (i32, i32) {
    %c0_i32 = arith.constant 0 : i32
    %c0_i32_0 = arith.constant 0 : i32
    %c0_i32_1 = arith.constant 0 : i32
    return %c0_i32, %c0_i32_0 : i32, i32
  }
  func.func @transform_3(%arg0: i32, %arg1: i32) -> (i32, i32) {
    %c0_i32 = arith.constant 0 : i32
    %c0_i32_0 = arith.constant 0 : i32
    %c0_i32_1 = arith.constant 0 : i32
    return %c0_i32, %c0_i32_0 : i32, i32
  }
  func.func @transform_4(%arg0: i32, %arg1: i32) -> (i32, i32) {
    %c0_i32 = arith.constant 0 : i32
    %c0_i32_0 = arith.constant 0 : i32
    %c0_i32_1 = arith.constant 0 : i32
    return %c0_i32, %c0_i32_0 : i32, i32
  }
  func.func @transform_5(%arg0: i32, %arg1: i32) -> (i32, i32) {
    %c0_i32 = arith.constant 0 : i32
    %c0_i32_0 = arith.constant 0 : i32
    return %arg0, %c0_i32 : i32, i32
  }
}

</mosaic_0001>

<bundles_post_ra>
// kernel: tpu_custom_call.1
= control target key start
LH: loop header
LB: loop body
LE: loop exit
PB: predicated region body
PF: predicated region fallthrough
CT: control target
= control target key end

     0   :  { %s1611_s0 = inlined_call_operand.hbm [shape: bf16[16,1536], index: 0, kind: input, shape index: {}]   ;;  %s1612_s1 = inlined_call_operand.hbm [shape: bf16[1536,128], index: 1, kind: input, shape index: {}]   ;;  %s1613_s2 = inlined_call_operand.vmem [shape: f32[1,128], index: 2, kind: input, shape index: {}]   ;;  %s1614_s3 = inlined_call_operand.hbm [shape: bf16[128,128], index: 3, kind: input, shape index: {}]   ;;  %s1615_s4 = inlined_call_operand.vmem [shape: f32[1,128], index: 4, kind: input, shape index: {}]   ;;  %s1616_s5 = inlined_call_operand.hbm [shape: f32[16,128], index: 5, kind: output, shape index: {}]  }
   0x1   :  { %1621 = sst [smem:[#allocation17_spill]] %s1611_s0 }
   0x2   :  { %1622 = sst [smem:[#allocation18_spill]] %s1614_s3 }
   0x3   :  { %10 = vsyncpa [#allocation4], 0 }
   0x4   :  { %12 = vsyncpa [#allocation4 + $0x1], 0 }
   0x5   :  { %13 = vsyncpa [#allocation7], 0 }
   0x6   :  { %15 = vsyncpa [#allocation7 + $0x1], 0 }
   0x7   :  { %16 = vsyncpa [#allocation5], 0  ;;  %s1424_s18 = smov 0   ;;  %s1426_s19 = smov 0  }
   0x8   :  { %s1428_s20 = smov 0   ;;  %s1430_s21 = smov 0  }
   0x9   :  { %s1432_s22 = smov 0   ;;  %s1434_s23 = smov 0  }
   0xa LB: > { %1623 = sst [smem:[#allocation14_spill]] %s1370_s20  ;;  %s1453_s24 = sadd.s32 4294967295, %s1382_s23   ;;  %s1382_s23 = sphi %s1434_s23, %s22_s23   ;;  %s1378_s22 = sphi %s1432_s22, %s1640_s22   ;;  %s1374_s21 = sphi %s1430_s21, %s1639_s21   ;;  %s1370_s20 = sphi %s1428_s20, %s1635_s20   ;;  %s1366_s19 = sphi %s1426_s19, %s1638_s19   ;;  %s1362_s18 = sphi %s1424_s18, %s1637_s18  }
   0xb   : > { %p56_p0 = scmp.ne.s32.totalorder %s1366_s19, %s1362_s18  ;;  %p57_p1 = scmp.eq.s32.totalorder %s1453_s24, 0 }
   0xc   : > { %p873_p2 = scmp.ge.s32.totalorder %s1382_s23, 1  ;;  %p182_p3 = scmp.lt.s32.totalorder %s1382_s23, 4 }
   0xd   : > { %p1461_p4 = por %p57_p1, %p56_p0  ;;  %s1625_s3 = sld [smem:[#allocation18_spill]] }
   0xe   : > { %p1468_p5 = pnand %p873_p2, %p182_p3  ;;  %s1384_s30 = smov [#allocation8]  }
   0xf   : > { %s198_s6 = sshll.u32 %s1384_s30, 4  ;;  %s1617_s7 = smov 64   ;;  %s199_s6 = int_to_ptr.vmem [resolvable:$true] %s198_s6 }
  0x10   : > { %p1126_p6 = pneg %p1468_p5  ;;  %s1618_s8 = smov 4  }
  0x11   : > { %s31_s9 = sadd.s32 1, %s1378_s22  ;;  %s43_s10 = sadd.s32 1, %s1370_s20 }
  0x12   : > { %p1127_p7 = pnand %p1126_p6, %p57_p1  ;;  %p32_p8 = scmp.ge.s32.totalorder %s31_s9, 3 }
  0x13   : > { %s196_s28 = sshll.u32 %s1625_s3, 4  ;;  %p50_p9 = scmp.ne.s32.totalorder %s1370_s20, %s1366_s19  ;;  %s197_s28 = int_to_ptr.hbm [resolvable:$true] %s196_s28 }
  0x14   : > { %1129 = dma.hbm_to_vmem [thread:$0]  (!%p1127_p7), %s197_s28, 1024, %s199_s6, [#allocation7], %s1617_s7, %s1617_s7, %s1618_s8  }
  0x15   : > { %p51_p10 = scmp.eq.s32.totalorder %s1382_s23, 0  ;;  %s1642_s9 = smov (%p32_p8, %s31_s9), 0 }
  0x16   : > { %1627 = sst [smem:[#allocation15_spill]] %s1642_s9  ;;  %p1138_p12 = scmp.lt.s32.totalorder %s1382_s23, 3 }
  0x17   : > { %p1486_p11 = por %p51_p10, %p50_p9  ;;  %s39_s12 = ssub.s32 %s1378_s22, %s1642_s9 }
  0x18   : > { %s215_s13 = sand.u32 1, %s1370_s20   ;;  %p41_p13 = scmp.eq.s32.totalorder %s39_s12, 0 }
  0x19   : > { %s876_s14 = sshll.u32 %s215_s13, 5  ;;  %s1068_s15 = sshll.u32 %s1378_s22, 4 }
  0x1a   : > { %s1496_s16 = scalar_select %p41_p13, %s1370_s20, %s43_s10  }
  0x1b   : > { %s1630_s0 = sld [smem:[#allocation17_spill]]  ;;  %s219_s28 = scalar_lea.vmem [#allocation3], %s876_s14 }
  0x1c   : > { %1629 = sst [smem:[#allocation16_spill]] %s1496_s16  ;;  %s230_s30 = sshll.u32 %s219_s28, 4  ;;  %s231_s30 = int_to_ptr.vmem [resolvable:$true] %s230_s30 }
  0x1d   : > { %p1505_p0 = pnand %p1138_p12, %p1486_p11  ;;  %s240_s12 = sand.u32 1, %s1382_s23  }
  0x1e   : > { %s216_s10 = scalar_lea.sflag [#allocation4], %s215_s13  ;;  %s1387_s7 = smov 768  }
  0x1f   : > { %s1388_s8 = smov 256   ;;  %s1389_s3 = smov 16  }
  0x20   : > { %s1069_s14 = sshll.u32 %s1378_s22, 8  ;;  %s241_s9 = scalar_lea.sflag [#allocation7], %s240_s12 }
  0x21   : > { %s227_s26 = scalar_lea.hbm %s1630_s0, %s1068_s15  ;;  %s879_s15 = sshll.u32 %s215_s13, 8 }
  0x22   : > { %s228_s27 = sshll.u32 %s227_s26, 4  ;;  %s249_s11 = scalar_lea.hbm %s1612_s1, %s1069_s14  ;;  %s229_s27 = int_to_ptr.hbm [resolvable:$true] %s228_s27 }
  0x23   : > { %1133 = dma.hbm_to_vmem [thread:$0]  (!%p1505_p0), %s229_s27, 512, %s231_s30, %s216_s10, %s1387_s7, %s1388_s8, %s1389_s3  }
  0x24   : > { %s244_s26 = scalar_lea.vmem [#allocation6], %s879_s15  ;;  %s250_s0 = sshll.u32 %s249_s11, 4  ;;  %s251_s0 = int_to_ptr.hbm [resolvable:$true] %s250_s0 }
  0x25   : > { %s252_s28 = sshll.u32 %s244_s26, 4  ;;  %s1632_s16 = smov 4   ;;  %s253_s28 = int_to_ptr.vmem [resolvable:$true] %s252_s28 }
  0x26   : > { %s1633_s20 = smov 64   ;;  %264 = sbr.rel (%p1468_p5) target bundleno = 415 (0x19f), region = 40 }
  0x27   : > { %1136 = dma.hbm_to_vmem [thread:$0]  (!%p1505_p0), %s251_s0, 4096, %s253_s28, %s241_s9, %s1633_s20, %s1633_s20, %s1632_s16  }
  0x28   : > { %s266_s3 = sand.u32 (!%p1468_p5), 1, %s1366_s19  }
  0x29   : > { %s883_s7 = sshll.u32 (!%p1468_p5), %s266_s3, 5  ;;  %s267_s8 = scalar_lea.sflag (!%p1468_p5), [#allocation4], %s266_s3 }
  0x2a   : > { %s1524_s13 = scalar_lea.vmem (!%p1468_p5), [#allocation3], %s883_s7 }
  0x2b   : > { %1345 = dma.done.wait (%p1461_p4), %s267_s8, 512  }
  0x2c   : > { %1347 = vsyncadd (%p1461_p4), %s267_s8, 4294966784  ;;  %s276_s27 = sand.u32 1, %s1453_s24   ;;  %s884_s30 = sshll.u32 %s266_s3, 8 }
  0x2d   : > { %s277_s0 = scalar_lea.sflag [#allocation7], %s276_s27  ;;  %s1531_s20 = scalar_lea.vmem [#allocation6], %s884_s30 }
  0x2e   : > { %1349 = dma.done.wait (%p1461_p4), %s277_s0, 4096  }
  0x2f   : > { %1351 = vsyncadd (%p1461_p4), %s277_s0, 4294963200 }
  0x30   : > { %1353 = dma.done.wait (%p57_p1), [#allocation7], 1024  }
  0x31   : > { %1355 = vsyncadd (%p57_p1), [#allocation7], 4294966272  ;;  %p886_p2 = scmp.ne.s32.totalorder %s1374_s21, 0 }
  0x33   : > { %320 = sbr.rel (%p886_p2) target bundleno = 59 (0x3b), region = 56 }
  0x38   : > { %v1390_v0 = vmov 0.0  }
  0x39   : > { %321 = vst [vmem:[#allocation2] sm:$0xff] %v1390_v0 }
  0x3a   : > { %322 = vst [vmem:[#allocation2 + $0x8] sm:$0xff] %v1390_v0 }
  0x3b PF: > { %v1081_v1 = vld [vmem:[%s1531_s20 + $0x38] sm:$0xff]  ;;  %v1080_v5 = vld [vmem:[%s1531_s20 + $0x30] sm:$0xff]  ;;  %v1079_v9 = vld [vmem:[%s1531_s20 + $0x28] sm:$0xff]  ;;  %p1031_p1 = scmp.ne.s32.totalorder %s1374_s21, 2 }
  0x3c   : > { %v1089_v2 = vld [vmem:[%s1531_s20 + $0x78] sm:$0xff]  ;;  %605 = vmatpush.bf16.msra.mxu0 %v1081_v1  ;;  %v1088_v6 = vld [vmem:[%s1531_s20 + $0x70] sm:$0xff]  ;;  %v1087_v10 = vld [vmem:[%s1531_s20 + $0x68] sm:$0xff] }
  0x3d   : > { %v1097_v3 = vld [vmem:[%s1531_s20 + $0xb8] sm:$0xff]  ;;  %619 = vmatpush.bf16.msra.mxu1 %v1089_v2  ;;  %v1096_v7 = vld [vmem:[%s1531_s20 + $0xb0] sm:$0xff]  ;;  %v1095_v11 = vld [vmem:[%s1531_s20 + $0xa8] sm:$0xff] }
  0x3e   : > { %v1105_v4 = vld [vmem:[%s1531_s20 + $0xf8] sm:$0xff]  ;;  %633 = vmatpush.bf16.msra.mxu2 %v1097_v3  ;;  %v1104_v8 = vld [vmem:[%s1531_s20 + $0xf0] sm:$0xff]  ;;  %v1103_v12 = vld [vmem:[%s1531_s20 + $0xe8] sm:$0xff] }
  0x3f   : > { %647 = vmatpush.bf16.msra.mxu3 %v1105_v4  ;;  %v1078_v13 = vld [vmem:[%s1531_s20 + $0x20] sm:$0xff]  ;;  %v1077_v17 = vld [vmem:[%s1531_s20 + $0x18] sm:$0xff]  ;;  %v1076_v21 = vld [vmem:[%s1531_s20 + $0x10] sm:$0xff] }
  0x40   : > { %606 = vmatpush.bf16.msra.mxu0 %v1080_v5  ;;  %v1086_v14 = vld [vmem:[%s1531_s20 + $0x60] sm:$0xff]  ;;  %v1085_v18 = vld [vmem:[%s1531_s20 + $0x58] sm:$0xff]  ;;  %v1084_v22 = vld [vmem:[%s1531_s20 + $0x50] sm:$0xff] }
  0x41   : > { %620 = vmatpush.bf16.msra.mxu1 %v1088_v6  ;;  %v1094_v15 = vld [vmem:[%s1531_s20 + $0xa0] sm:$0xff]  ;;  %v1093_v19 = vld [vmem:[%s1531_s20 + $0x98] sm:$0xff]  ;;  %v1092_v23 = vld [vmem:[%s1531_s20 + $0x90] sm:$0xff] }
  0x42   : > { %634 = vmatpush.bf16.msra.mxu2 %v1096_v7  ;;  %v1102_v16 = vld [vmem:[%s1531_s20 + $0xe0] sm:$0xff]  ;;  %v1101_v20 = vld [vmem:[%s1531_s20 + $0xd8] sm:$0xff]  ;;  %v1100_v24 = vld [vmem:[%s1531_s20 + $0xd0] sm:$0xff] }
  0x43   : > { %648 = vmatpush.bf16.msra.mxu3 %v1104_v8  ;;  %v1075_v25 = vld [vmem:[%s1531_s20 + $0x8] sm:$0xff]  ;;  %v1074_v29 = vld [vmem:[%s1531_s20] sm:$0xff]  ;;  %v1072_v34 = vld [vmem:[%s1524_s13 + $0xc] sm:$0xf0] }
  0x44   : > { %607 = vmatpush.bf16.msra.mxu0 %v1079_v9  ;;  %v1083_v26 = vld [vmem:[%s1531_s20 + $0x48] sm:$0xff]  ;;  %v1082_v30 = vld [vmem:[%s1531_s20 + $0x40] sm:$0xff]  ;;  %v891_v36 = vld [vmem:[%s1524_s13 + $0x10] sm:$0xf0] }
  0x45   : > { %621 = vmatpush.bf16.msra.mxu1 %v1087_v10  ;;  %v1091_v27 = vld [vmem:[%s1531_s20 + $0x88] sm:$0xff]  ;;  %v1090_v31 = vld [vmem:[%s1531_s20 + $0x80] sm:$0xff]  ;;  %v1073_v38 = vld [vmem:[%s1524_s13 + $0x14] sm:$0xf0] }
  0x46   : > { %635 = vmatpush.bf16.msra.mxu2 %v1095_v11  ;;  %v1099_v28 = vld [vmem:[%s1531_s20 + $0xc8] sm:$0xff]  ;;  %v1098_v32 = vld [vmem:[%s1531_s20 + $0xc0] sm:$0xff]  ;;  %v899_v40 = vld [vmem:[%s1524_s13 + $0x18] sm:$0xf0] }
  0x47   : > { %649 = vmatpush.bf16.msra.mxu3 %v1103_v12  ;;  %v889_v33 = vld [vmem:[%s1524_s13] sm:$0xf]  ;;  %v1070_v35 = vld [vmem:[%s1524_s13 + $0x4] sm:$0xf]  ;;  %v897_v37 = vld [vmem:[%s1524_s13 + $0x8] sm:$0xf] }
  0x48   : > { %608 = vmatpush.bf16.msra.mxu0 %v1078_v13  ;;  %v1071_v39 = vld [vmem:[%s1524_s13 + $0xc] sm:$0xf]  ;;  %v890_v41 = vor.u32 %v1072_v34, %v889_v33  ;;  %v894_v42 = vor.u32 %v1070_v35, %v891_v36  ;;  %v898_v43 = vor.u32 %v1073_v38, %v897_v37  ;;  %v323_v51 = vld [vmem:[#allocation2] sm:$0xff]  ;;  %v324_v59 = vld [vmem:[#allocation2 + $0x8] sm:$0xff] }
  0x49   : > { %622 = vmatpush.bf16.msra.mxu1 %v1086_v14  ;;  %v902_v44 = vor.u32 %v1071_v39, %v899_v40 }
  0x4a   : > { %636 = vmatpush.bf16.msra.mxu2 %v1094_v15 }
  0x4b   : > { %650 = vmatpush.bf16.msra.mxu3 %v1102_v16 }
  0x4c   : > { %609 = vmatpush.bf16.msra.mxu0 %v1077_v17 }
  0x4d   : > { %623 = vmatpush.bf16.msra.mxu1 %v1085_v18 }
  0x4e   : > { %637 = vmatpush.bf16.msra.mxu2 %v1093_v19 }
  0x4f   : > { %651 = vmatpush.bf16.msra.mxu3 %v1101_v20 }
  0x50   : > { %610 = vmatpush.bf16.msra.mxu0 %v1076_v21 }
  0x51   : > { %624 = vmatpush.bf16.msra.mxu1 %v1084_v22 }
  0x52   : > { %638 = vmatpush.bf16.msra.mxu2 %v1092_v23 }
  0x53   : > { %652 = vmatpush.bf16.msra.mxu3 %v1100_v24 }
  0x54   : > { %611 = vmatpush.bf16.msra.mxu0 %v1075_v25 }
  0x55   : > { %625 = vmatpush.bf16.msra.mxu1 %v1083_v26 }
  0x56   : > { %639 = vmatpush.bf16.msra.mxu2 %v1091_v27 }
  0x57   : > { %653 = vmatpush.bf16.msra.mxu3 %v1099_v28 }
  0x58   : > { %612 = vmatpush.bf16.msra.mxu0 %v1074_v29 }
  0x59   : > { %626 = vmatpush.bf16.msra.mxu1 %v1082_v30 }
  0x5a   : > { %640 = vmatpush.bf16.msra.mxu2 %v1090_v31 }
  0x5b   : > { %654 = vmatpush.bf16.msra.mxu3 %v1098_v32  ;;  %613 = vmatmul.bf16.vlgmr.msra.gmra.mxu0 %v890_v41 }
  0x5c   : > { %627 = vmatmul.bf16.vlgmr.msra.gmra.mxu1 %v894_v42 }
  0x5d   : > { %641 = vmatmul.bf16.vlgmr.msra.gmra.mxu2 %v898_v43 }
  0x5e   : > { %655 = vmatmul.bf16.vlgmr.msra.gmra.mxu3 %v902_v44 }
  0xd8   : > { %v614_v45 = vpop.f32.mrf.mxu0 }
  0xd9   : > { %v628_v46 = vpop.f32.mrf.mxu1 }
  0xda   : > { %v629_v47 = vadd.f32 %v628_v46, %v614_v45 }
  0xe0   : > { %v642_v48 = vpop.f32.mrf.mxu2  ;;  %v616_v53 = vpop.f32.mrf.mxu0 }
  0xe1   : > { %v656_v49 = vpop.f32.mrf.mxu3  ;;  %v643_v50 = vadd.f32 %v642_v48, %v629_v47  ;;  %v630_v54 = vpop.f32.mrf.mxu1 }
  0xe2   : > { %v631_v56 = vadd.f32 %v630_v54, %v616_v53 }
  0xe3   : > { %v657_v52 = vadd.f32 %v656_v49, %v643_v50 }
  0xe5   : > { %v661_v55 = vadd.f32 %v657_v52, %v323_v51 }
  0xe7   : > { %663 = vst [vmem:[#allocation2] sm:$0xff] %v661_v55 }
  0xe8   : > { %v644_v57 = vpop.f32.mrf.mxu2 }
  0xe9   : > { %v645_v58 = vadd.f32 %v644_v57, %v631_v56  ;;  %v658_v60 = vpop.f32.mrf.mxu3 }
  0xeb   : > { %v659_v61 = vadd.f32 %v658_v60, %v645_v58  ;;  %668 = sbr.rel (%p1031_p1) target bundleno = 409 (0x199), region = 60 }
  0xed   : > { %v662_v62 = vadd.f32 %v659_v61, %v324_v59 }
  0xef   : > { %664 = vst [vmem:[#allocation2 + $0x8] sm:$0xff] %v662_v62 }
  0xf0   : > { %v1113_v63 = vld [vmem:[#allocation8 + $0x38] sm:$0xff]  ;;  %v1112_v0 = vld [vmem:[#allocation8 + $0x30] sm:$0xff]  ;;  %v1111_v1 = vld [vmem:[#allocation8 + $0x28] sm:$0xff] }
  0xf1   : > { %746 = vmatpush.bf16.msra.mxu0 %v1113_v63  ;;  %v1110_v2 = vld [vmem:[#allocation8 + $0x20] sm:$0xff]  ;;  %v1109_v3 = vld [vmem:[#allocation8 + $0x18] sm:$0xff]  ;;  %v1108_v4 = vld [vmem:[#allocation8 + $0x10] sm:$0xff] }
  0xf2   : > { %v1200_v5 = vld [vmem:[%s1613_s2] ss:$0 sm:$0xff]  ;;  %v1107_v6 = vld [vmem:[#allocation8 + $0x8] sm:$0xff]  ;;  %v1106_v11 = vld [vmem:[#allocation8] sm:$0xff] }
  0xf3   : > { %v669_v7 = vld [vmem:[#allocation2] sm:$0xff] }
  0xf4   : > { %v675_v9 = vadd.f32 %v1200_v5, %v669_v7  ;;  %v1201_v13 = vld [vmem:[%s1615_s4] ss:$0 sm:$0xff] }
  0xf5   : > { %747 = vmatpush.bf16.msra.mxu0 %v1112_v0 }
  0xf6   : > { %v670_v8 = vld [vmem:[#allocation2 + $0x8] sm:$0xff] }
  0xf7   : > { %v676_v10 = vadd.f32 %v1200_v5, %v670_v8 }
  0xf9   : > { %748 = vmatpush.bf16.msra.mxu0 %v1111_v1  ;;  %v677_v12 = vpack.c.bf16 %v676_v10, %v675_v9 }
  0xfd   : > { %749 = vmatpush.bf16.msra.mxu0 %v1110_v2 }
 0x101   : > { %750 = vmatpush.bf16.msra.mxu0 %v1109_v3 }
 0x105   : > { %751 = vmatpush.bf16.msra.mxu0 %v1108_v4 }
 0x109   : > { %752 = vmatpush.bf16.msra.mxu0 %v1107_v6 }
 0x10d   : > { %753 = vmatpush.bf16.msra.mxu0 %v1106_v11 }
 0x110   : > { %754 = vmatmul.bf16.vlgmr.msra.gmra.mxu0 %v677_v12 }
 0x18d   : > { %v755_v14 = vpop.f32.mrf.mxu0 }
 0x18e   : > { %v756_v15 = vadd.f32 %v1201_v13, %v755_v14 }
 0x190   : > { %760 = vst [vmem:[#allocation9] sm:$0xff] %v756_v15 }
 0x195   : > { %v757_v16 = vpop.f32.mrf.mxu0 }
 0x196   : > { %v758_v17 = vadd.f32 %v1201_v13, %v757_v16 }
 0x198   : > { %761 = vst [vmem:[#allocation9 + $0x8] sm:$0xff] %v758_v17 }
 0x199 PF: > { %p1140_p3 = scmp.eq.s32.totalorder %s1453_s24, 2  ;;  %s772_s12 = sshll.u32 %s1616_s5, 4  ;;  %s773_s12 = int_to_ptr.hbm [resolvable:$true] %s772_s12 }
 0x19a   : > { %s1391_s10 = smov [#allocation9]   ;;  %s1392_s14 = smov 128  }
 0x19b   : > { %s770_s15 = sshll.u32 %s1391_s10, 4  ;;  %s1393_s17 = smov 8   ;;  %s771_s15 = int_to_ptr.vmem [resolvable:$true] %s770_s15 }
 0x19c   : > { %1123 = dma.vmem_to_hbm [thread:$0]  (%p1140_p3), %s771_s15, 256, %s773_s12, [#allocation5], %s1392_s14, %s1392_s14, %s1393_s17  }
 0x19d   : > { %1357 = dma.done.wait (%p1140_p3), [#allocation5], 256  }
 0x19e   : > { %1359 = vsyncadd (%p1140_p3), [#allocation5], 4294967040 }
 0x19f PF: > { %s22_s23 = sadd.s32 1, %s1382_s23   ;;  %s1634_s11 = sld [smem:[#allocation14_spill]] }
 0x1a0   : > { %p19_p4 = scmp.ge.s32.totalorder %s22_s23, 5   ;;  %s1635_s20 = sld [smem:[#allocation16_spill]] }
 0x1a1   : > { %s1636_s24 = sld [smem:[#allocation15_spill]]  ;;  %s1637_s18 = smov %s1366_s19 }
 0x1a2   : > { %s1639_s21 = smov %s1378_s22 }
 0x1a3   :  { %21 = sbr.rel (!%p19_p4) target bundleno = 10 (0xa), region = 103 }
 0x1a5   : > { %s1638_s19 = smov %s1634_s11 }
 0x1a7   : > { %s1640_s22 = smov %s1636_s24 }
 0x1a8   :  { %789 = vsyncpa [#allocation4], 1 }
 0x1a9   :  { %791 = vsyncpa [#allocation4 + $0x1], 1 }
 0x1aa   :  { %792 = vsyncpa [#allocation7], 1 }
 0x1ab   :  { %794 = vsyncpa [#allocation7 + $0x1], 1 }
 0x1ac   :  { %795 = vsyncpa [#allocation5], 1 }
 0x1ad   :  { %797 = vsyncpa [#allocation5 + $0x1], 1 }

</bundles_post_ra>
